<compile_context>
chip_gen: v5e
topology: v5e:2x2
jax: 0.10.0
libtpu: 0.0.40
codegen_flags: <defaults>
</compile_context>

<pallas_src>
import numpy as np
import jax
import jax.numpy as jnp
from jax.experimental import pallas as pl
from jax.experimental.pallas import tpu as pltpu

BLOCKSIZE = 8                       # c.blocksize_dct
CHANNEL_DCT = BLOCKSIZE * BLOCKSIZE  # c.channel_dct


def make_dct_matrix(bs: int) -> np.ndarray:
    """Orthonormal DCT-II matrix A, shape (bs, bs)."""
    A = np.zeros((bs, bs), dtype=np.float64)
    for i in range(bs):
        c_i = 1.0 / np.sqrt(2.0) if i == 0 else 1.0
        for n in range(bs):
            A[i, n] = np.sqrt(2.0 / bs) * c_i * np.cos((2 * n + 1) / (bs * 2) * i * np.pi)
    return A.astype(np.float32)


def make_block_diag(A: np.ndarray, num_blocks: int) -> np.ndarray:
    """Block-diagonal replication of A, shape (num_blocks*bs, num_blocks*bs)."""
    bs = A.shape[0]
    out = np.zeros((num_blocks * bs, num_blocks * bs), dtype=np.float32)
    for b in range(num_blocks):
        out[b * bs:(b + 1) * bs, b * bs:(b + 1) * bs] = A
    return out


def _pick_tile(dim: int, candidates) -> int:
    for c in candidates:
        if dim % c == 0:
            return c
    return dim


def _make_dct_kernel(n_chunks: int, cw: int):
    """Kernel: Y_tile = AH_strip @ X_tile, then per-128-col chunk (@ AWT_strip)."""
    def _dct_kernel(ah_ref, awt_ref, x_ref, y_ref):
        # ah_ref: (TH, TH) block-diag strip, awt_ref: (CW, CW) block-diag strip^T,
        # x_ref/y_ref: (1, TH, TW)
        x = x_ref[0]                                                      # (TH, TW)
        awt = awt_ref[...]                                                # (CW, CW)
        t = jnp.dot(ah_ref[...], x, preferred_element_type=jnp.float32)  # row DCT
        for c in range(n_chunks):                                         # static unroll (<=4)
            sl = slice(c * cw, (c + 1) * cw)
            y_ref[0, :, sl] = jnp.dot(t[:, sl], awt,
                                      preferred_element_type=jnp.float32)  # col DCT
    return _dct_kernel


def dct2d_forward(x: jax.Array, blocksize: int = BLOCKSIZE) -> jax.Array:
    """x: (N, 1, H, W) float32 -> (N, blocksize**2, H//bs, W//bs) float32."""
    N, C, H, W = x.shape
    assert C == 1, "DCT is only implemented for a single channel"
    bs = blocksize
    assert H % bs == 0 and W % bs == 0
    Hb, Wb = H // bs, W // bs

    # Tile sizes: 128-row strips; lane dim a multiple of 128 (up to 512), else full W.
    TH = 128 if H % 128 == 0 else H
    TW = _pick_tile(W, (512, 256, 128))
    CW = 128 if TW % 128 == 0 else TW     # column-strip width for the 2nd matmul
    n_chunks = TW // CW

    A = make_dct_matrix(bs)
    ah = jnp.asarray(make_block_diag(A, TH // bs))        # (TH, TH)   <= 64 KiB
    awt = jnp.asarray(make_block_diag(A, CW // bs).T)     # (CW, CW)   <= 64 KiB
    x3 = x[:, 0, :, :].astype(jnp.float32)                # (N, H, W)

    grid = (N, H // TH, W // TW)

    y = pl.pallas_call(
        _make_dct_kernel(n_chunks, CW),
        out_shape=jax.ShapeDtypeStruct((N, H, W), jnp.float32),
        grid_spec=pltpu.PrefetchScalarGridSpec(
            num_scalar_prefetch=0,
            grid=grid,
            in_specs=[
                pl.BlockSpec((TH, TH), lambda n, i, j: (0, 0)),   # AH strip (shared)
                pl.BlockSpec((CW, CW), lambda n, i, j: (0, 0)),   # AW^T strip (shared)
                pl.BlockSpec((1, TH, TW), lambda n, i, j: (n, i, j)),
            ],
            out_specs=pl.BlockSpec((1, TH, TW), lambda n, i, j: (n, i, j)),
        ),
        compiler_params=pltpu.CompilerParams(
            dimension_semantics=("parallel", "parallel", "parallel"),
            vmem_limit_bytes=32 * 1024 * 1024,
        ),
    )(ah, awt, x3)

    # Rearrange Y[n, bi*bs+u, bj*bs+v] -> out[n, u*bs+v, bi, bj]   (cheap JAX glue).
    y = y.reshape(N, Hb, bs, Wb, bs)
    y = jnp.transpose(y, (0, 2, 4, 1, 3))
    return y.reshape(N, bs * bs, Hb, Wb)


def _reference(x: jax.Array, blocksize: int = BLOCKSIZE) -> jax.Array:
    """Pure-JAX reference of the blockwise orthonormal DCT-II."""
    N, _, H, W = x.shape
    bs = blocksize
    Hb, Wb = H // bs, W // bs
    A = jnp.asarray(make_dct_matrix(bs))
    blocks = x[:, 0].reshape(N, Hb, bs, Wb, bs).transpose(0, 1, 3, 2, 4)  # (N,Hb,Wb,bs,bs)
    coeff = jnp.einsum("up,nijpq,vq->nijuv", A, blocks, A)
    return coeff.transpose(0, 3, 4, 1, 2).reshape(N, bs * bs, Hb, Wb)


if __name__ == "__main__":
    key = jax.random.PRNGKey(0)

    # Small shape consistent with the module (single channel).
    N, C, H, W = 2, 1, 16, 16
    x_small = jax.random.normal(key, (N, C, H, W), dtype=jnp.float32)
    out_small = jax.block_until_ready(dct2d_forward(x_small, BLOCKSIZE))
    ref_small = _reference(x_small, BLOCKSIZE)
    assert out_small.shape == (N, CHANNEL_DCT, H // BLOCKSIZE, W // BLOCKSIZE)
    np.testing.assert_allclose(np.asarray(out_small), np.asarray(ref_small),
                               atol=1e-4, rtol=1e-4)

    # Moderate shape exercising the tiled 128-strip path (grid > 1, chunked cols).
    key2 = jax.random.PRNGKey(1)
    N2, H2, W2 = 1, 256, 512
    x_big = jax.random.normal(key2, (N2, 1, H2, W2), dtype=jnp.float32)
    out_big = jax.block_until_ready(dct2d_forward(x_big, BLOCKSIZE))
    ref_big = _reference(x_big, BLOCKSIZE)
    assert out_big.shape == (N2, CHANNEL_DCT, H2 // BLOCKSIZE, W2 // BLOCKSIZE)
    np.testing.assert_allclose(np.asarray(out_big), np.asarray(ref_big),
                               atol=1e-4, rtol=1e-4)

    print("KERNEL_OK")
</pallas_src>

<mosaic_0001>
module attributes {stable_mosaic.version = 11 : i64} {
  func.func @_dct_kernel(%arg0: i32, %arg1: i32, %arg2: i32, %arg3: memref<16x16xf32, #tpu.memory_space<vmem>>, %arg4: memref<16x16xf32, #tpu.memory_space<vmem>>, %arg5: memref<1x16x16xf32, #tpu.memory_space<vmem>>, %arg6: memref<1x16x16xf32, #tpu.memory_space<vmem>>) attributes {dimension_semantics = [#tpu.dimension_semantics<parallel>, #tpu.dimension_semantics<parallel>, #tpu.dimension_semantics<parallel>], iteration_bounds = array<i64: 2, 1, 1>, scalar_prefetch = 0 : i64, scratch_operands = 0 : i64, tpu.core_type = #tpu.core_type<tc>, window_params = [{pipeline_mode = #tpu.pipeline_mode<synchronous>, transform_indices = @transform_0, window_bounds = array<i64: 16, 16>}, {pipeline_mode = #tpu.pipeline_mode<synchronous>, transform_indices = @transform_1, window_bounds = array<i64: 16, 16>}, {transform_indices = @transform_2, window_bounds = array<i64: 1, 16, 16>}, {transform_indices = @transform_3, window_bounds = array<i64: 1, 16, 16>}]} {
    %c0 = arith.constant 0 : index
    %c0_0 = arith.constant 0 : index
    %c0_1 = arith.constant 0 : index
    %0 = vector.load %arg5[%c0, %c0_0, %c0_1] : memref<1x16x16xf32, #tpu.memory_space<vmem>>, vector<1x16x16xf32>
    %1 = vector.shape_cast %0 : vector<1x16x16xf32> to vector<16x16xf32>
    %c0_2 = arith.constant 0 : index
    %c0_3 = arith.constant 0 : index
    %2 = vector.load %arg4[%c0_2, %c0_3] : memref<16x16xf32, #tpu.memory_space<vmem>>, vector<16x16xf32>
    %c0_4 = arith.constant 0 : index
    %c0_5 = arith.constant 0 : index
    %3 = vector.load %arg3[%c0_4, %c0_5] : memref<16x16xf32, #tpu.memory_space<vmem>>, vector<16x16xf32>
    %cst = arith.constant dense<0.000000e+00> : vector<16x16xf32>
    %4 = tpu.matmul %3, %1, %cst {dimension_numbers = #tpu.dot_dimension_numbers<[1], [0], [0], [1], [0, 0, 1, 1], [], []>} : vector<16x16xf32>, vector<16x16xf32>, vector<16x16xf32> -> vector<16x16xf32>
    %cst_6 = arith.constant dense<0.000000e+00> : vector<16x16xf32>
    %5 = tpu.matmul %4, %2, %cst_6 {dimension_numbers = #tpu.dot_dimension_numbers<[1], [0], [0], [1], [0, 0, 1, 1], [], []>} : vector<16x16xf32>, vector<16x16xf32>, vector<16x16xf32> -> vector<16x16xf32>
    %c0_7 = arith.constant 0 : index
    %c0_8 = arith.constant 0 : index
    %c0_9 = arith.constant 0 : index
    %6 = vector.load %arg6[%c0_7, %c0_8, %c0_9] : memref<1x16x16xf32, #tpu.memory_space<vmem>>, vector<1x16x16xf32>
    %7 = vector.shape_cast %6 : vector<1x16x16xf32> to vector<16x16xf32>
    %8 = vector.shape_cast %5 : vector<16x16xf32> to vector<1x16x16xf32>
    tpu.vector_store %arg6[%c0_7, %c0_8, %c0_9], %8 {strides = array<i32>} : memref<1x16x16xf32, #tpu.memory_space<vmem>>, vector<1x16x16xf32>,
    return
  }
  func.func @transform_0(%arg0: i32, %arg1: i32, %arg2: i32) -> (i32, i32) {
    %c0_i32 = arith.constant 0 : i32
    %c0_i32_0 = arith.constant 0 : i32
    %c0_i32_1 = arith.constant 0 : i32
    return %c0_i32, %c0_i32_0 : i32, i32
  }
  func.func @transform_1(%arg0: i32, %arg1: i32, %arg2: i32) -> (i32, i32) {
    %c0_i32 = arith.constant 0 : i32
    %c0_i32_0 = arith.constant 0 : i32
    %c0_i32_1 = arith.constant 0 : i32
    return %c0_i32, %c0_i32_0 : i32, i32
  }
  func.func @transform_2(%arg0: i32, %arg1: i32, %arg2: i32) -> (i32, i32, i32) {
    %c0_i32 = arith.constant 0 : i32
    return %arg0, %arg1, %arg2 : i32, i32, i32
  }
  func.func @transform_3(%arg0: i32, %arg1: i32, %arg2: i32) -> (i32, i32, i32) {
    %c0_i32 = arith.constant 0 : i32
    return %arg0, %arg1, %arg2 : i32, i32, i32
  }
}

</mosaic_0001>

<bundles_post_ra>
// kernel: tpu_custom_call.1
= control target key start
LH: loop header
LB: loop body
LE: loop exit
PB: predicated region body
PF: predicated region fallthrough
CT: control target
= control target key end

     0   :  { %s945_s0 = inlined_call_operand.hbm [shape: f32[16,16], index: 0, kind: input, shape index: {}]   ;;  %s946_s1 = inlined_call_operand.hbm [shape: f32[16,16], index: 1, kind: input, shape index: {}]   ;;  %s947_s2 = inlined_call_operand.hbm [shape: f32[2,16,16], index: 2, kind: input, shape index: {}]   ;;  %s948_s3 = inlined_call_operand.hbm [shape: f32[2,16,16], index: 3, kind: output, shape index: {}]  }
   0x1   :  { %951 = sst [smem:[#allocation13_spill]] %s945_s0 }
   0x2   :  { %8 = vsyncpa [#allocation3], 0 }
   0x3   :  { %9 = vsyncpa [#allocation6], 0 }
   0x4   :  { %10 = vsyncpa [#allocation4], 0 }
   0x5   :  { %12 = vsyncpa [#allocation4 + $0x1], 0  ;;  %s775_s12 = smov 0   ;;  %s777_s13 = smov 0  }
   0x6   :  { %s779_s14 = smov 0   ;;  %s781_s15 = smov 0  }
   0x7   :  { %s783_s16 = smov 0   ;;  %s785_s17 = smov 0  }
   0x8 LB: > { %s806_s18 = sadd.s32 4294967295, %s747_s17   ;;  %s452_s19 = sadd.s32 4294967294, %s747_s17   ;;  %s747_s17 = sphi %s785_s17, %s18_s17   ;;  %s743_s16 = sphi %s783_s16, %s964_s16   ;;  %s739_s15 = sphi %s781_s15, %s963_s15   ;;  %s735_s14 = sphi %s779_s14, %s962_s14   ;;  %s731_s13 = sphi %s777_s13, %s961_s13   ;;  %s727_s12 = sphi %s775_s12, %s960_s12  }
   0x9   : > { %p103_p0 = scmp.ne.s32.totalorder %s731_s13, %s727_s12  ;;  %p104_p1 = scmp.eq.s32.totalorder %s806_s18, 0 }
   0xa   : > { %p131_p2 = scmp.eq.s32.totalorder %s806_s18, 1  ;;  %p137_p3 = scmp.eq.s32.totalorder %s452_s19, 1 }
   0xb   : > { %p815_p4 = por %p104_p1, %p103_p0  ;;  %p453_p5 = scmp.ge.s32.totalorder %s747_s17, 1 }
   0xc   : > { %p820_p6 = por %p137_p3, %p103_p0  ;;  %p144_p7 = scmp.lt.s32.totalorder %s747_s17, 3 }
   0xd   : > { %s954_s0 = sld [smem:[#allocation13_spill]]  ;;  %s749_s26 = smov [#allocation2]  }
   0xe   : > { %p828_p8 = pnand %p453_p5, %p144_p7  ;;  %s157_s27 = sshll.u32 %s749_s26, 4  ;;  %s158_s27 = int_to_ptr.vmem [resolvable:$true] %s157_s27 }
   0xf   : > { %p456_p11 = scmp.ge.s32.totalorder %s747_s17, 2  ;;  %s169_s30 = sshll.u32 %s946_s1, 4  ;;  %s170_s30 = int_to_ptr.hbm [resolvable:$true] %s169_s30 }
  0x10   : > { %p492_p9 = pneg %p828_p8  ;;  %s949_s4 = smov 128  }
  0x11   : > { %s950_s5 = smov 8   ;;  %s752_s6 = smov [#allocation5]  }
  0x12   : > { %p493_p10 = pnand %p492_p9, %p104_p1  ;;  %s171_s7 = sshll.u32 %s752_s6, 4  ;;  %s172_s7 = int_to_ptr.vmem [resolvable:$true] %s171_s7 }
  0x13   : > { %s155_s24 = sshll.u32 %s954_s0, 4  ;;  %s37_s8 = sadd.s32 1, %s743_s16  ;;  %s156_s24 = int_to_ptr.hbm [resolvable:$true] %s155_s24 }
  0x14   : > { %495 = dma.hbm_to_vmem [thread:$0]  (!%p493_p10), %s156_s24, 256, %s158_s27, [#allocation3], %s949_s4, %s949_s4, %s950_s5  }
  0x15   : > { %498 = dma.hbm_to_vmem [thread:$0]  (!%p493_p10), %s170_s30, 256, %s172_s7, [#allocation6], %s949_s4, %s949_s4, %s950_s5  }
  0x16   : > { %s90_s9 = sadd.s32 1, %s735_s14  ;;  %p39_p12 = scmp.ge.s32.totalorder %s37_s8, 2 }
  0x17   : > { %p97_p13 = scmp.ne.s32.totalorder %s735_s14, %s731_s13  ;;  %p98_p0 = scmp.eq.s32.totalorder %s747_s17, 0 }
  0x18   : > { %p509_p3 = scmp.lt.s32.totalorder %s747_s17, 2  ;;  %s966_s8 = smov (%p39_p12, %s37_s8), 0 }
  0x19   : > { %p854_p5 = por %p98_p0, %p97_p13  ;;  %p860_p7 = por %p131_p2, %p97_p13 }
  0x1a   : > { %s83_s19 = ssub.s32 %s743_s16, %s966_s8  ;;  %s185_s22 = sand.u32 1, %s747_s17  }
  0x1b   : > { %p88_p9 = scmp.eq.s32.totalorder %s83_s19, 0  ;;  %s187_s23 = sand.u32 1, %s735_s14  }
  0x1c   : > { %s474_s24 = sshll.u32 %s743_s16, 4  ;;  %s457_s27 = sshll.u32 %s187_s23, 4 }
  0x1d   : > { %s870_s26 = scalar_select %p88_p9, %s735_s14, %s90_s9  }
  0x1e   : > { %s197_s30 = scalar_lea.hbm %s947_s2, %s474_s24  ;;  %s189_s7 = scalar_lea.vmem [#allocation7], %s457_s27 }
  0x1f   : > { %s198_s6 = sshll.u32 %s197_s30, 4  ;;  %s200_s4 = sshll.u32 %s189_s7, 4  ;;  %s199_s6 = int_to_ptr.hbm [resolvable:$true] %s198_s6  ;;  %s201_s4 = int_to_ptr.vmem [resolvable:$true] %s200_s4 }
  0x20   : > { %p500_p2 = pnand %p509_p3, %p854_p5  ;;  %s186_s5 = scalar_lea.sflag [#allocation3], %s185_s22 }
  0x21   : > { %s958_s0 = smov 8   ;;  %s959_s19 = smov 128  }
  0x22   : > { %502 = dma.hbm_to_vmem [thread:$0]  (!%p500_p2), %s199_s6, 256, %s201_s4, %s186_s5, %s959_s19, %s959_s19, %s958_s0  }
  0x23   : > { %212 = sbr.rel (%p828_p8) target bundleno = 319 (0x13f), region = 32 }
  0x28   : > { %710 = dma.done.wait (%p104_p1), [#allocation3], 256  }
  0x29   : > { %712 = vsyncadd (%p104_p1), [#allocation3], 4294967040 }
  0x2a   : > { %714 = dma.done.wait (%p104_p1), [#allocation6], 256  }
  0x2b   : > { %716 = vsyncadd (%p104_p1), [#allocation6], 4294967040  ;;  %s224_s0 = sand.u32 1, %s806_s18   ;;  %s226_s4 = sand.u32 1, %s731_s13  }
  0x2c   : > { %s463_s25 = sshll.u32 %s226_s4, 4  ;;  %s225_s5 = scalar_lea.sflag [#allocation3], %s224_s0 }
  0x2d   : > { %s228_s9 = scalar_lea.vmem [#allocation7], %s463_s25 }
  0x2e   : > { %718 = dma.done.wait (%p815_p4), %s225_s5, 256  }
  0x2f   : > { %720 = vsyncadd (%p815_p4), %s225_s5, 4294967040  ;;  %v255_v0 = vld [vmem:[%s228_s9 + $0x8] sm:$0xff]  ;;  %v254_v1 = vld [vmem:[%s228_s9] sm:$0xff]  ;;  %vm260_vm0 = vcmask 130048   ;;  %s251_s18 = scalar_lea.vmem [#allocation8], %s463_s25  ;;  %s475_s20 = sshll.u32 %s739_s15, 4 }
  0x30   : > { %476 = vmatpush.msra.mxu2 %v255_v0  ;;  %v259_v2 = vld [vmem:[#allocation2 + $0x8] sm:$0xff]  ;;  %281 = vmatpush.msra.mxu0 %v255_v0  ;;  %v258_v3 = vld [vmem:[#allocation2] sm:$0xff]  ;;  %v257_v4 = vld [vmem:[#allocation5 + $0x8] sm:$0xff]  ;;  %s336_s23 = scalar_lea.hbm %s948_s3, %s475_s20  ;;  %s337_s24 = sshll.u32 %s251_s18, 4  ;;  %s338_s24 = int_to_ptr.vmem [resolvable:$true] %s337_s24 }
  0x31   : > { %478 = vmatpush.msra.mxu3 %v257_v4  ;;  %310 = vmatpush.msra.mxu1 %v257_v4  ;;  %v256_v5 = vld [vmem:[#allocation5] sm:$0xff]  ;;  %s339_s27 = sshll.u32 %s336_s23, 4  ;;  %s322_s28 = scalar_lea.sflag [#allocation4], %s226_s4  ;;  %s340_s27 = int_to_ptr.hbm [resolvable:$true] %s339_s27 }
  0x32   : > { %477 = vmatpush.msra.mxu2 %v254_v1  ;;  %282 = vmatpush.msra.mxu0 %v254_v1  ;;  %s671_s29 = sshra.s32 %s340_s27, 4  ;;  %s677_s7 = scalar_lea.hbm %s948_s3, 32  ;;  %s672_s29 = int_to_ptr.hbm [resolvable:$true] %s671_s29 }
  0x33   : > { %466 = vmatmul.msk.f32.vlgmr.msra.gmra.mxu2 %vm260_vm0, %v259_v2  ;;  %465 = vmatmul.msk.f32.vlgmr.msra.gmra.mxu0 %vm260_vm0, %v258_v3  ;;  %s673_s30 = scalar_lea.hbm %s672_s29, 16  ;;  %p678_p10 = scmp.lt.s32.totalorder %s672_s29, %s948_s3 }
  0x34   : > { %479 = vmatpush.msra.mxu3 %v256_v5  ;;  %311 = vmatpush.msra.mxu1 %v256_v5  ;;  %p674_p1 = scmp.ne.s32.totalorder %s672_s29, %s673_s30  ;;  %p679_p12 = scmp.lt.s32.totalorder %s677_s7, %s673_s30 }
  0x36   : > { %p675_p4 = pnand %p674_p1, %p860_p7  ;;  %p680_p13 = por %p679_p12, %p678_p10 }
  0x38   : > { %p676_p8 = pneg %p675_p4 }
  0x3a   : > { %p681_p0 = pnand %p680_p13, %p676_p8 }
  0xb0   : > { %v284_v6 = vpop.f32.mrf.mxu0 }
  0xb1   : > { %467 = vmatmul.msk.f32.vlgmr.msra.gmra.mxu1 %vm260_vm0, %v284_v6 }
  0xb6   : > { %v287_v7 = vpop.f32.mrf.mxu2 }
  0xb7   : > { %468 = vmatmul.msk.f32.vlgmr.msra.gmra.mxu3 %vm260_vm0, %v287_v7 }
 0x12e   : > { %v313_v8 = vpop.f32.mrf.mxu1 }
 0x12f   : > { %319 = vst.msk [vmem:[%s251_s18] sm:$0xff] %vm260_vm0, %v313_v8 }
 0x13a   : > { %v316_v9 = vpop.f32.mrf.mxu3 }
 0x13b   : > { %320 = vst.msk [vmem:[%s251_s18 + $0x8] sm:$0xff] %vm260_vm0, %v316_v9 }
 0x13c   : > { %684 = shalt.err (!%p681_p0)
}
 0x13d   : > { %s753_s4 = smov 128   ;;  %s754_s25 = smov 8  }
 0x13e   : > { %490 = dma.vmem_to_hbm [thread:$0]  (%p860_p7), %s338_s24, 256, %s340_s27, %s322_s28, %s753_s4, %s753_s4, %s754_s25  }
 0x13f PF: > { %s354_s5 = sand.u32 1, %s727_s12   ;;  %p504_p3 = pnand %p456_p11, %p820_p6 }
 0x140   : > { %s355_s9 = scalar_lea.sflag [#allocation4], %s354_s5 }
 0x141   : > { %p505_p5 = pneg %p504_p3 }
 0x143   : > { %722 = dma.done.wait (%p505_p5), %s355_s9, 256  }
 0x144   : > { %724 = vsyncadd (%p505_p5), %s355_s9, 4294967040  ;;  %s18_s17 = sadd.s32 1, %s747_s17   ;;  %s960_s12 = smov %s731_s13 }
 0x145   : > { %p15_p9 = scmp.ge.s32.totalorder %s18_s17, 4   ;;  %s961_s13 = smov %s735_s14 }
 0x146   : > { %s962_s14 = smov %s870_s26  ;;  %s963_s15 = smov %s743_s16 }
 0x147   : > { %s964_s16 = smov %s966_s8  ;;  %17 = sbr.rel (!%p15_p9) target bundleno = 8 (0x8), region = 84 }
 0x14c   :  { %361 = vsyncpa [#allocation3], 1 }
 0x14d   :  { %363 = vsyncpa [#allocation3 + $0x1], 1 }
 0x14e   :  { %364 = vsyncpa [#allocation6], 1 }
 0x14f   :  { %365 = vsyncpa [#allocation4], 1 }
 0x150   :  { %367 = vsyncpa [#allocation4 + $0x1], 1 }

</bundles_post_ra>
